<compile_context>
chip_gen: v6e
topology: v6e:2x2x1
jax: 0.10.0
libtpu: 0.0.40
codegen_flags: <defaults>
</compile_context>

<pallas_src>
import jax
import jax.numpy as jnp
import numpy as np
from jax.experimental import pallas as pl
from jax.experimental.pallas import tpu as pltpu

HIDDEN = 768        # fixed by the module: nn.Linear(768, 768)
TILE_H = 384        # hidden-output tile (parallel axis): 3*128 lanes, 2 steps for v7x's 2 TCs
TILE_N_MAX = 256    # chunk tile (reduction axis): multiple of 16 (bf16 packs 2 rows/sublane)


def _round_up(v, m):
    return ((v + m - 1) // m) * m


def _pooler_segmean_kernel(x_ref, wt_ref, b_ref, s_ref, inv_ref, out_ref):
    """out[D, th] = sum_k S[D, tn_k] @ tanh(x[tn_k, H] @ Wt[H, th] + b[th]); scaled by 1/count."""
    k = pl.program_id(1)  # chunk-tile (reduction) axis — last grid axis

    @pl.when(k == 0)
    def _init():
        out_ref[...] = jnp.zeros_like(out_ref)

    # Pooler: bf16 MXU matmul, f32 accumulation; bias + tanh in f32.
    pooled = jnp.dot(x_ref[...], wt_ref[...], preferred_element_type=jnp.float32)
    pooled = jnp.tanh(pooled + b_ref[...])                      # [tile_n, TILE_H] f32

    # Segment partial sums: binary S (f32, exact) @ pooled (f32).  D is tiny, so this
    # matmul is negligible next to x@Wt; keeping it f32 preserves exact means.
    out_ref[...] += jnp.dot(s_ref[...], pooled, preferred_element_type=jnp.float32)

    @pl.when(k == pl.num_programs(1) - 1)
    def _finalize():
        out_ref[...] = out_ref[...] * inv_ref[...]              # exact 1/count scale in f32


def prepare_segments(num_sublists, n_chunks):
    """Host-side, once per batch: binary doc-assignment matrix + reciprocal counts + tiling."""
    n_docs = len(num_sublists)
    assert sum(num_sublists) == n_chunks
    if n_chunks <= TILE_N_MAX:
        n_pad = max(_round_up(n_chunks, 16), 16)    # bf16-friendly sublane multiple
    else:
        n_pad = _round_up(n_chunks, TILE_N_MAX)
    d_pad = max(_round_up(n_docs, 8), 8)

    seg = np.zeros((d_pad, n_pad), np.float32)      # binary: S[d, c] = 1 if chunk c in doc d
    inv = np.zeros((d_pad, 1), np.float32)          # 1 / chunk-count per document
    base = 0
    for d, cnt in enumerate(num_sublists):
        seg[d, base:base + cnt] = 1.0
        inv[d, 0] = 1.0 / float(cnt)
        base += cnt
    return jnp.asarray(seg), jnp.asarray(inv)


def prepare_pooler_params(weight, bias):
    """Once at model-load time: pre-transpose W to [H_in, H_out] bf16, bias to [1, H] f32."""
    wt_bf16 = jnp.asarray(weight, jnp.float32).T.astype(jnp.bfloat16)
    b2 = jnp.asarray(bias, jnp.float32).reshape(1, HIDDEN)
    return wt_bf16, b2


@jax.jit
def bert_parts_forward(cls_embeddings, wt_bf16, bias2d, seg, inv_counts):
    """
    cls_embeddings: [N_chunks, 768]  (BERT last_hidden_state[:, 0, :] per chunk)
    wt_bf16:        [768, 768] bf16  (pre-transposed pooler weight)
    bias2d:         [1, 768]   f32
    seg:            [D_pad, N_pad] f32 binary doc-assignment matrix
    inv_counts:     [D_pad, 1] f32 reciprocal chunk counts
    returns:        [D_pad, 768] f32  (valid docs are the first len(num_sublists) rows)
    """
    n_chunks = cls_embeddings.shape[0]
    d_pad, n_pad = seg.shape
    tile_n = n_pad if n_pad <= TILE_N_MAX else TILE_N_MAX
    assert n_pad % tile_n == 0 and HIDDEN % TILE_H == 0

    # Pad chunks to the tile multiple; padded rows are zero and masked out by S's zero columns.
    x = jnp.zeros((n_pad, HIDDEN), jnp.bfloat16).at[:n_chunks, :].set(
        cls_embeddings.astype(jnp.bfloat16)
    )

    grid = (HIDDEN // TILE_H, n_pad // tile_n)   # (parallel hidden tiles, arbitrary chunk reduction)

    out = pl.pallas_call(
        _pooler_segmean_kernel,
        out_shape=jax.ShapeDtypeStruct((d_pad, HIDDEN), jnp.float32),
        grid_spec=pltpu.PrefetchScalarGridSpec(
            num_scalar_prefetch=0,
            grid=grid,
            in_specs=[
                pl.BlockSpec((tile_n, HIDDEN), lambda j, k: (k, 0)),   # x: streams over chunks
                pl.BlockSpec((HIDDEN, TILE_H), lambda j, k: (0, j)),   # Wt: resident across k
                pl.BlockSpec((1, TILE_H),      lambda j, k: (0, j)),   # bias: resident across k
                pl.BlockSpec((d_pad, tile_n),  lambda j, k: (0, k)),   # binary S: streams over chunks
                pl.BlockSpec((d_pad, 1),       lambda j, k: (0, 0)),   # 1/count: constant
            ],
            out_specs=pl.BlockSpec((d_pad, TILE_H), lambda j, k: (0, j)),  # resident accumulator
        ),
        compiler_params=pltpu.CompilerParams(
            dimension_semantics=("parallel", "arbitrary"),
            vmem_limit_bytes=32 * 1024 * 1024,   # tiles sized well under v7x's 64 MiB physical VMEM
        ),
    )(x, wt_bf16, bias2d, seg, inv_counts)

    return out


def _reference_f32(cls_embeddings, weight, bias, num_sublists):
    """Module semantics (pure f32) reference."""
    pooled = jnp.tanh(cls_embeddings @ jnp.asarray(weight, jnp.float32).T
                      + jnp.asarray(bias, jnp.float32))
    outs, base = [], 0
    for cnt in num_sublists:
        outs.append(jnp.mean(pooled[base:base + cnt], axis=0))
        base += cnt
    return jnp.stack(outs, axis=0)


def _reference_bf16_matched(cls_embeddings, wt_bf16, bias2d, num_sublists):
    """Reference with the same bf16-input / f32-accumulate matmul the kernel uses."""
    x = cls_embeddings.astype(jnp.bfloat16)
    pooled = jnp.tanh(jnp.dot(x, wt_bf16, preferred_element_type=jnp.float32) + bias2d)
    outs, base = [], 0
    for cnt in num_sublists:
        outs.append(jnp.mean(pooled[base:base + cnt], axis=0))
        base += cnt
    return jnp.stack(outs, axis=0)


if __name__ == "__main__":
    key = jax.random.PRNGKey(0)
    k_x, k_w, k_b = jax.random.split(key, 3)

    # 3 "documents" split into [2, 1, 3] chunks -> 6 chunk-level CLS embeddings.
    num_sublists = [2, 1, 3]
    n_chunks = sum(num_sublists)
    n_docs = len(num_sublists)

    # Synthetic CLS embeddings standing in for the frozen BERT's [CLS] outputs.
    cls_embeddings = jax.random.normal(k_x, (n_chunks, HIDDEN), jnp.float32)

    # Deterministic pooler parameters (nn.Linear(768, 768)).
    weight = jax.random.normal(k_w, (HIDDEN, HIDDEN), jnp.float32) * 0.02
    bias = jax.random.normal(k_b, (HIDDEN,), jnp.float32) * 0.02

    # One-time preparation (model load / batch setup) — not repeated per forward.
    wt_bf16, bias2d = prepare_pooler_params(weight, bias)
    seg, inv_counts = prepare_segments(num_sublists, n_chunks)

    out_padded = bert_parts_forward(cls_embeddings, wt_bf16, bias2d, seg, inv_counts)
    out_padded = jax.block_until_ready(out_padded)
    out = np.asarray(out_padded)[:n_docs]

    assert out.shape == (n_docs, HIDDEN)

    # Tight check vs. a reference that uses the same bf16-input matmul semantics.
    ref_matched = np.asarray(_reference_bf16_matched(cls_embeddings, wt_bf16, bias2d, num_sublists))
    np.testing.assert_allclose(out, ref_matched, rtol=1e-5, atol=1e-5)

    # Loose check vs. pure-f32 module semantics (bf16 MXU inputs cost ~3 decimal digits).
    ref_f32 = np.asarray(_reference_f32(cls_embeddings, weight, bias, num_sublists))
    np.testing.assert_allclose(out, ref_f32, rtol=2e-2, atol=2e-2)

    print("KERNEL_OK")
</pallas_src>

<mosaic_0001>
module attributes {stable_mosaic.version = 11 : i64} {
  func.func @_pooler_segmean_kernel(%arg0: i32, %arg1: i32, %arg2: memref<16x768xbf16, #tpu.memory_space<vmem>>, %arg3: memref<768x384xbf16, #tpu.memory_space<vmem>>, %arg4: memref<1x384xf32, #tpu.memory_space<vmem>>, %arg5: memref<8x16xf32, #tpu.memory_space<vmem>>, %arg6: memref<8x1xf32, #tpu.memory_space<vmem>>, %arg7: memref<8x384xf32, #tpu.memory_space<vmem>>) attributes {dimension_semantics = [#tpu.dimension_semantics<parallel>, #tpu.dimension_semantics<arbitrary>], iteration_bounds = array<i64: 2, 1>, scalar_prefetch = 0 : i64, scratch_operands = 0 : i64, tpu.core_type = #tpu.core_type<tc>, window_params = [{transform_indices = @transform_0, window_bounds = array<i64: 16, 768>}, {transform_indices = @transform_1, window_bounds = array<i64: 768, 384>}, {transform_indices = @transform_2, window_bounds = array<i64: 1, 384>}, {transform_indices = @transform_3, window_bounds = array<i64: 8, 16>}, {pipeline_mode = #tpu.pipeline_mode<synchronous>, transform_indices = @transform_4, window_bounds = array<i64: 8, 1>}, {transform_indices = @transform_5, window_bounds = array<i64: 8, 384>}]} {
    %c0_i32 = arith.constant 0 : i32
    %0 = arith.cmpi eq, %arg1, %c0_i32 : i32
    %1 = arith.extui %0 : i1 to i32
    %c0_i32_0 = arith.constant 0 : i32
    %2 = arith.cmpi ne, %1, %c0_i32_0 : i32
    scf.if %2 {
      %cst_15 = arith.constant 0.000000e+00 : f32
      %18 = vector.broadcast %cst_15 : f32 to vector<8x384xf32>
      %c0_16 = arith.constant 0 : index
      %c0_17 = arith.constant 0 : index
      %19 = vector.load %arg7[%c0_16, %c0_17] : memref<8x384xf32, #tpu.memory_space<vmem>>, vector<8x384xf32>
      tpu.vector_store %arg7[%c0_16, %c0_17], %18 {strides = array<i32>} : memref<8x384xf32, #tpu.memory_space<vmem>>, vector<8x384xf32>,
    } else {
    }
    %c0 = arith.constant 0 : index
    %c0_1 = arith.constant 0 : index
    %3 = vector.load %arg2[%c0, %c0_1] : memref<16x768xbf16, #tpu.memory_space<vmem>>, vector<16x768xbf16>
    %c0_2 = arith.constant 0 : index
    %c0_3 = arith.constant 0 : index
    %4 = vector.load %arg3[%c0_2, %c0_3] : memref<768x384xbf16, #tpu.memory_space<vmem>>, vector<768x384xbf16>
    %cst = arith.constant dense<0.000000e+00> : vector<16x384xf32>
    %5 = tpu.matmul %3, %4, %cst {dimension_numbers = #tpu.dot_dimension_numbers<[1], [0], [0], [1], [0, 0, 1, 1], [], []>} : vector<16x768xbf16>, vector<768x384xbf16>, vector<16x384xf32> -> vector<16x384xf32>
    %c0_4 = arith.constant 0 : index
    %c0_5 = arith.constant 0 : index
    %6 = vector.load %arg4[%c0_4, %c0_5] : memref<1x384xf32, #tpu.memory_space<vmem>>, vector<1x384xf32>
    %7 = vector.broadcast %6 : vector<1x384xf32> to vector<16x384xf32>
    %8 = arith.addf %5, %7 : vector<16x384xf32>
    %9 = math.tanh %8 : vector<16x384xf32>
    %c0_6 = arith.constant 0 : index
    %c0_7 = arith.constant 0 : index
    %10 = vector.load %arg7[%c0_6, %c0_7] : memref<8x384xf32, #tpu.memory_space<vmem>>, vector<8x384xf32>
    %c0_8 = arith.constant 0 : index
    %c0_9 = arith.constant 0 : index
    %11 = vector.load %arg5[%c0_8, %c0_9] : memref<8x16xf32, #tpu.memory_space<vmem>>, vector<8x16xf32>
    %cst_10 = arith.constant dense<0.000000e+00> : vector<8x384xf32>
    %12 = tpu.matmul %11, %9, %cst_10 {dimension_numbers = #tpu.dot_dimension_numbers<[1], [0], [0], [1], [0, 0, 1, 1], [], []>} : vector<8x16xf32>, vector<16x384xf32>, vector<8x384xf32> -> vector<8x384xf32>
    %13 = arith.addf %10, %12 : vector<8x384xf32>
    %c0_11 = arith.constant 0 : index
    %c0_12 = arith.constant 0 : index
    %14 = vector.load %arg7[%c0_11, %c0_12] : memref<8x384xf32, #tpu.memory_space<vmem>>, vector<8x384xf32>
    tpu.vector_store %arg7[%c0_11, %c0_12], %13 {strides = array<i32>} : memref<8x384xf32, #tpu.memory_space<vmem>>, vector<8x384xf32>,
    %c0_i32_13 = arith.constant 0 : i32
    %15 = arith.cmpi eq, %arg1, %c0_i32_13 : i32
    %16 = arith.extui %15 : i1 to i32
    %c0_i32_14 = arith.constant 0 : i32
    %17 = arith.cmpi ne, %16, %c0_i32_14 : i32
    scf.if %17 {
      %c0_15 = arith.constant 0 : index
      %c0_16 = arith.constant 0 : index
      %18 = vector.load %arg7[%c0_15, %c0_16] : memref<8x384xf32, #tpu.memory_space<vmem>>, vector<8x384xf32>
      %c0_17 = arith.constant 0 : index
      %c0_18 = arith.constant 0 : index
      %19 = vector.load %arg6[%c0_17, %c0_18] : memref<8x1xf32, #tpu.memory_space<vmem>>, vector<8x1xf32>
      %20 = vector.broadcast %19 : vector<8x1xf32> to vector<8x384xf32>
      %21 = arith.mulf %18, %20 : vector<8x384xf32>
      %c0_19 = arith.constant 0 : index
      %c0_20 = arith.constant 0 : index
      %22 = vector.load %arg7[%c0_19, %c0_20] : memref<8x384xf32, #tpu.memory_space<vmem>>, vector<8x384xf32>
      tpu.vector_store %arg7[%c0_19, %c0_20], %21 {strides = array<i32>} : memref<8x384xf32, #tpu.memory_space<vmem>>, vector<8x384xf32>,
    } else {
    }
    return
  }
  func.func @transform_0(%arg0: i32, %arg1: i32) -> (i32, i32) {
    %c0_i32 = arith.constant 0 : i32
    %c0_i32_0 = arith.constant 0 : i32
    return %arg1, %c0_i32 : i32, i32
  }
  func.func @transform_1(%arg0: i32, %arg1: i32) -> (i32, i32) {
    %c0_i32 = arith.constant 0 : i32
    %c0_i32_0 = arith.constant 0 : i32
    return %c0_i32, %arg0 : i32, i32
  }
  func.func @transform_2(%arg0: i32, %arg1: i32) -> (i32, i32) {
    %c0_i32 = arith.constant 0 : i32
    %c0_i32_0 = arith.constant 0 : i32
    return %c0_i32, %arg0 : i32, i32
  }
  func.func @transform_3(%arg0: i32, %arg1: i32) -> (i32, i32) {
    %c0_i32 = arith.constant 0 : i32
    %c0_i32_0 = arith.constant 0 : i32
    return %c0_i32, %arg1 : i32, i32
  }
  func.func @transform_4(%arg0: i32, %arg1: i32) -> (i32, i32) {
    %c0_i32 = arith.constant 0 : i32
    %c0_i32_0 = arith.constant 0 : i32
    %c0_i32_1 = arith.constant 0 : i32
    return %c0_i32, %c0_i32_0 : i32, i32
  }
  func.func @transform_5(%arg0: i32, %arg1: i32) -> (i32, i32) {
    %c0_i32 = arith.constant 0 : i32
    %c0_i32_0 = arith.constant 0 : i32
    return %c0_i32, %arg0 : i32, i32
  }
}

</mosaic_0001>

<bundles_post_ra>
// kernel: bert_parts_forward.1
= control target key start
LH: loop header
LB: loop body
LE: loop exit
PB: predicated region body
PF: predicated region fallthrough
CT: control target
= control target key end

     0   :  { %s3073_s0 = inlined_call_operand.vmem [shape: bf16[16,768], index: 0, kind: input, shape index: {}]   ;;  %s3074_s1 = inlined_call_operand.hbm [shape: bf16[768,768], index: 1, kind: input, shape index: {}]   ;;  %s3075_s2 = inlined_call_operand.hbm [shape: f32[1,768], index: 2, kind: input, shape index: {}]   ;;  %s3076_s3 = inlined_call_operand.hbm [shape: f32[8,16], index: 3, kind: input, shape index: {}]   ;;  %s3077_s4 = inlined_call_operand.vmem [shape: f32[8,1], index: 4, kind: input, shape index: {}]   ;;  %s3078_s5 = inlined_call_operand.hbm [shape: f32[8,768], index: 5, kind: output, shape index: {}]  }
   0x1   :  { %3086 = sst [smem:[#allocation18_spill]] %s3074_s1 }
   0x2   :  { %3087 = sst [smem:[#allocation19_spill]] %s3076_s3 }
   0x3   :  { %3088 = sst [smem:[#allocation20_spill]] %s3078_s5 }
   0x4   :  { %10 = vsyncpa [#allocation3], 0 }
   0x5   :  { %12 = vsyncpa [#allocation3 + $0x1], 0 }
   0x6   :  { %13 = vsyncpa [#allocation6], 0 }
   0x7   :  { %15 = vsyncpa [#allocation6 + $0x1], 0 }
   0x8   :  { %16 = vsyncpa [#allocation4], 0 }
   0x9   :  { %18 = vsyncpa [#allocation4 + $0x1], 0  ;;  %s2693_s18 = smov 0   ;;  %s2695_s19 = smov 0  }
   0xa   :  { %s2697_s20 = smov 0   ;;  %s2699_s21 = smov 0  }
   0xb   :  { %s2701_s22 = smov 0   ;;  %s2703_s23 = smov 0  }
   0xc LB: > { %3089 = sst [smem:[#allocation13_spill]] %s2631_s18  ;;  %s2724_s24 = sadd.s32 4294967295, %s2651_s23   ;;  %s2651_s23 = sphi %s2703_s23, %s24_s23   ;;  %s2647_s22 = sphi %s2701_s22, %s3116_s22   ;;  %s2643_s21 = sphi %s2699_s21, %s3115_s21   ;;  %s2639_s20 = sphi %s2697_s20, %s3111_s20   ;;  %s2635_s19 = sphi %s2695_s19, %s3114_s19   ;;  %s2631_s18 = sphi %s2693_s18, %s3113_s18  }
   0xd   : > { %3090 = sst [smem:[#allocation14_spill]] %s2639_s20  ;;  %s1935_s25 = sadd.s32 4294967294, %s2651_s23  }
   0xe   : > { %s69_s26 = sadd.s32 1, %s2639_s20  ;;  %p76_p0 = scmp.ne.s32.totalorder %s2639_s20, %s2635_s19 }
   0xf   : > { %p77_p1 = scmp.eq.s32.totalorder %s2651_s23, 0  ;;  %p82_p2 = scmp.ne.s32.totalorder %s2635_s19, %s2631_s18 }
  0x10   : > { %p83_p3 = scmp.eq.s32.totalorder %s2724_s24, 0  ;;  %p179_p4 = scmp.eq.s32.totalorder %s2724_s24, 1 }
  0x11   : > { %p2735_p5 = por %p77_p1, %p76_p0  ;;  %p185_p6 = scmp.eq.s32.totalorder %s1935_s25, 1 }
  0x12   : > { %p2741_p7 = por %p83_p3, %p82_p2  ;;  %p2745_p8 = por %p179_p4, %p76_p0 }
  0x13   : > { %p2749_p9 = por %p185_p6, %p82_p2  ;;  %p1936_p10 = scmp.ge.s32.totalorder %s2651_s23, 1 }
  0x14   : > { %s3092_s28 = scalar_select %p2741_p7, 1, 0 }
  0x15   : > { %s3093_s29 = scalar_select %p2745_p8, 1, 0 }
  0x16   : > { %s3094_s30 = scalar_select %p2749_p9, 1, 0 }
  0x17   : > { %p192_p11 = scmp.lt.s32.totalorder %s2651_s23, 3  ;;  %s2653_s7 = smov [#allocation7]  }
  0x18   : > { %3095 = sst [smem:[#allocation15_spill]] %s3094_s30  ;;  %s217_s8 = sshll.u32 %s2653_s7, 4  ;;  %s218_s8 = int_to_ptr.vmem [resolvable:$true] %s217_s8 }
  0x19   : > { %p2756_p13 = pnand %p1936_p10, %p192_p11  ;;  %p2209_p1 = scmp.lt.s32.totalorder %s2651_s23, 2 }
  0x1a   : > { %s36_s11 = sadd.s32 1, %s2647_s22  ;;  %s2777_s12 = sand.u32 1, %s2639_s20  }
  0x1b   : > { %p2193_p0 = pneg %p2756_p13  ;;  %p2765_p4 = pnand %p2209_p1, %p2735_p5 }
  0x1c   : > { %p38_p6 = scmp.ge.s32.totalorder %s36_s11, 2  ;;  %s2492_s13 = scalar_lea.vmem %s218_s8, 128 }
  0x1d   : > { %p2771_p2 = pnand %p2193_p0, %p83_p3  ;;  %p2493_p11 = scmp.ne.s32.totalorder %s218_s8, %s2492_s13 }
  0x1e   : > { %p2500_p5 = scmp.lt.s32.totalorder %s218_s8, %s218_s8  ;;  %p2501_p1 = scmp.lt.s32.totalorder %s2492_s13, %s2492_s13 }
  0x1f   : > { %p2483_p10 = pneg %p2771_p2 }
  0x20   : > { %p2502_p8 = por %p2501_p1, %p2500_p5 }
  0x21   : > { %p2495_p12 = pnand %p2493_p11, %p2483_p10 }
  0x23   : > { %p2496_p9 = pneg %p2495_p12 }
  0x25   : > { %p2503_p7 = pnand %p2502_p8, %p2496_p9 }
  0x27   : > { %2506 = shalt.err (!%p2503_p7)
}
  0x28   : > { %s3099_s3 = sld [smem:[#allocation19_spill]]  ;;  %s3118_s11 = smov (%p38_p6, %s36_s11), 0 }
  0x29   : > { %3100 = sst [smem:[#allocation16_spill]] %s3118_s11  ;;  %s2178_s16 = smul.u32 1152, %s2777_s12 }
  0x2a   : > { %s66_s17 = ssub.s32 %s2647_s22, %s3118_s11  ;;  %s2099_s25 = smul.u32 192, %s2647_s22 }
  0x2b   : > { %p67_p7 = scmp.eq.s32.totalorder %s66_s17, 0  ;;  %s3101_s1 = sld [smem:[#allocation18_spill]] }
  0x2c   : > { %s235_s13 = scalar_lea.vmem [#allocation2], %s2178_s16  ;;  %s232_s30 = scalar_lea.sflag [#allocation3], %s2777_s12 }
  0x2d   : > { %s242_s14 = sshll.u32 %s235_s13, 4  ;;  %p2509_p8 = pneg %p2765_p4  ;;  %s243_s14 = int_to_ptr.vmem [resolvable:$true] %s242_s14 }
  0x2e   : > { %2196 = dma.hbm_to_vmem [thread:$0]  (!%p2771_p2), %s3099_s3, 128, %s218_s8, [#allocation6]  }
  0x2f   : > { %s2798_s15 = scalar_select %p67_p7, %s2639_s20, %s69_s26  }
  0x30   : > { %s2520_s8 = scalar_lea.vmem %s243_s14, 18432  ;;  %s2654_s17 = smov [#allocation2]  }
  0x31   : > { %s241_s10 = scalar_lea.hbm %s3101_s1, %s2099_s25  ;;  %3102 = sst [smem:[#allocation17_spill]] %s2798_s15 }
  0x32   : > { %p2521_p9 = scmp.ne.s32.totalorder %s243_s14, %s2520_s8  ;;  %s2525_s3 = sshll.u32 %s2654_s17, 4  ;;  %s2526_s3 = int_to_ptr.vmem [resolvable:$false] %s2525_s3 }
  0x33   : > { %s2527_s27 = scalar_lea.vmem %s2526_s3, 36864  ;;  %p2528_p2 = scmp.lt.s32.totalorder %s243_s14, %s2526_s3 }
  0x34   : > { %p2523_p12 = pnand %p2521_p9, %p2509_p8  ;;  %p2529_p6 = scmp.lt.s32.totalorder %s2527_s27, %s2520_s8 }
  0x36   : > { %p2524_p0 = pneg %p2523_p12  ;;  %p2530_p10 = por %p2529_p6, %p2528_p2 }
  0x38   : > { %p2531_p11 = pnand %p2530_p10, %p2524_p0 }
  0x3a   : > { %2534 = shalt.err (!%p2531_p11)
}
  0x3b   : > { %s2655_s26 = smov 384   ;;  %s2656_s16 = smov 192  }
  0x3c   : > { %s2657_s25 = smov 12   ;;  %s252_s7 = sand.u32 1, %s2651_s23  }
  0x3d   : > { %2200 = dma.hbm_to_vmem [thread:$0]  (!%p2765_p4), %s241_s10, 18432, %s243_s14, %s232_s30, %s2655_s26, %s2656_s16, %s2657_s25  }
  0x3e   : > { %s2179_s13 = smul.u32 3, %s2777_s12  ;;  %s253_s15 = scalar_lea.sflag [#allocation6], %s252_s7 }
  0x3f   : > { %s2100_s17 = smul.u32 48, %s2647_s22  ;;  %s2658_s18 = smov [#allocation5]  }
  0x40   : > { %s256_s8 = scalar_lea.vmem [#allocation5], %s2179_s13  ;;  %s2553_s5 = sshll.u32 %s2658_s18, 4  ;;  %s2554_s5 = int_to_ptr.vmem [resolvable:$false] %s2553_s5 }
  0x41   : > { %s262_s3 = scalar_lea.hbm %s3075_s2, %s2100_s17  ;;  %s264_s27 = sshll.u32 %s256_s8, 4  ;;  %s265_s27 = int_to_ptr.vmem [resolvable:$true] %s264_s27 }
  0x42   : > { %s2548_s20 = scalar_lea.vmem %s265_s27, 48  ;;  %s2555_s30 = scalar_lea.vmem %s2554_s5, 96 }
  0x43   : > { %p2549_p5 = scmp.ne.s32.totalorder %s265_s27, %s2548_s20  ;;  %p2556_p9 = scmp.lt.s32.totalorder %s265_s27, %s2554_s5 }
  0x44   : > { %p2557_p12 = scmp.lt.s32.totalorder %s2555_s30, %s2548_s20 }
  0x45   : > { %p2551_p1 = pnand %p2549_p5, %p2509_p8 }
  0x46   : > { %p2558_p0 = por %p2557_p12, %p2556_p9 }
  0x47   : > { %p2552_p7 = pneg %p2551_p1 }
  0x49   : > { %p2559_p2 = pnand %p2558_p0, %p2552_p7 }
  0x4b   : > { %2562 = shalt.err (!%p2559_p2)
}
  0x4c   : > { %2203 = dma.hbm_to_vmem [thread:$0]  (!%p2765_p4), %s262_s3, 48, %s265_s27, %s253_s15  }
  0x4d   : > { %273 = sbr.rel (%p2756_p13) target bundleno = 678 (0x2a6), region = 40  ;;  %s2822_s1 = sand.u32 (!%p2756_p13), 1, %s2635_s19  }
  0x4e   : > { %s2180_s18 = smul.u32 (!%p2756_p13), 1152, %s2822_s1  ;;  %s276_s11 = scalar_lea.sflag (!%p2756_p13), [#allocation3], %s2822_s1 }
  0x4f   : > { %p3103_p8 = scmp.ne.s32.totalorder (!%p2756_p13), %s3092_s28, 0 }
  0x50   : > { %s2826_s12 = scalar_lea.vmem (!%p2756_p13), [#allocation2], %s2180_s18 }
  0x52   : > { %2614 = dma.done.wait (%p3103_p8), %s276_s11, 18432  }
  0x53   : > { %2616 = vsyncadd (%p3103_p8), %s276_s11, 4294948864  ;;  %s284_s5 = sand.u32 1, %s2724_s24   ;;  %s2181_s20 = smul.u32 3, %s2822_s1 }
  0x54   : > { %s285_s6 = scalar_lea.sflag [#allocation6], %s284_s5 }
  0x55   : > { %s2834_s9 = scalar_lea.vmem [#allocation5], %s2181_s20 }
  0x56   : > { %2618 = dma.done.wait (%p3103_p8), %s285_s6, 48  }
  0x57   : > { %2620 = vsyncadd (%p3103_p8), %s285_s6, 4294967248 }
  0x58   : > { %2622 = dma.done.wait (%p83_p3), [#allocation6], 128  }
  0x59   : > { %2624 = vsyncadd (%p83_p3), [#allocation6], 4294967168  ;;  %v2268_v0 = vld [vmem:[%s2826_s12 + $0xac] ss:$12 sps:$4 sm:$0xff]   ;;  %v2272_v2 = vld [vmem:[%s2826_s12 + $0xa8] ss:$12 sps:$4 sm:$0xff]  }
  0x5a   : > { %v2270_v1 = vld [vmem:[%s2826_s12 + $0x22c] ss:$12 sps:$4 sm:$0xff]   ;;  %1361 = vmatprep.subr.bf16.mxu0 %v2268_v0  ;;  %v2273_v3 = vld [vmem:[%s2826_s12 + $0x228] ss:$12 sps:$4 sm:$0xff]   ;;  %v2278_v6 = vld [vmem:[%s2826_s12 + $0x90] ss:$12 sps:$4 sm:$0xff]  }
  0x5b   : > { %1404 = vmatprep.subr.bf16.mxu1 %v2270_v1  ;;  %v2274_v4 = vld [vmem:[%s2826_s12 + $0x94] ss:$12 sps:$4 sm:$0xff]   ;;  %1362 = vmatpush1.bf16.msra.mxu0 %v2272_v2  ;;  %v2279_v7 = vld [vmem:[%s2826_s12 + $0x210] ss:$12 sps:$4 sm:$0xff]   ;;  %v2284_v10 = vld [vmem:[%s2826_s12 + $0x78] ss:$12 sps:$4 sm:$0xff]  }
  0x5c   : > { %1405 = vmatpush1.bf16.msra.mxu1 %v2273_v3  ;;  %v2276_v5 = vld [vmem:[%s2826_s12 + $0x214] ss:$12 sps:$4 sm:$0xff]   ;;  %1363 = vmatprep.subr.bf16.mxu0 %v2274_v4  ;;  %v2280_v8 = vld [vmem:[%s2826_s12 + $0x7c] ss:$12 sps:$4 sm:$0xff]   ;;  %v2285_v11 = vld [vmem:[%s2826_s12 + $0x1f8] ss:$12 sps:$4 sm:$0xff]  }
  0x5d   : > { %1406 = vmatprep.subr.bf16.mxu1 %v2276_v5  ;;  %v2282_v9 = vld [vmem:[%s2826_s12 + $0x1fc] ss:$12 sps:$4 sm:$0xff]   ;;  %v2286_v12 = vld [vmem:[%s2826_s12 + $0x64] ss:$12 sps:$4 sm:$0xff]   ;;  %v2290_v14 = vld [vmem:[%s2826_s12 + $0x60] ss:$12 sps:$4 sm:$0xff]  }
  0x5e   : > { %v2288_v13 = vld [vmem:[%s2826_s12 + $0x1e4] ss:$12 sps:$4 sm:$0xff]   ;;  %v2291_v15 = vld [vmem:[%s2826_s12 + $0x1e0] ss:$12 sps:$4 sm:$0xff]   ;;  %v2296_v18 = vld [vmem:[%s2826_s12 + $0x48] ss:$12 sps:$4 sm:$0xff]  }
  0x5f   : > { %1364 = vmatpush1.bf16.msra.mxu0 %v2278_v6  ;;  %v2292_v16 = vld [vmem:[%s2826_s12 + $0x4c] ss:$12 sps:$4 sm:$0xff]   ;;  %v2297_v19 = vld [vmem:[%s2826_s12 + $0x1c8] ss:$12 sps:$4 sm:$0xff]   ;;  %v2302_v22 = vld [vmem:[%s2826_s12 + $0x30] ss:$12 sps:$4 sm:$0xff]  }
  0x60   : > { %1407 = vmatpush1.bf16.msra.mxu1 %v2279_v7  ;;  %1365 = vmatprep.subr.bf16.mxu0 %v2280_v8  ;;  %v2294_v17 = vld [vmem:[%s2826_s12 + $0x1cc] ss:$12 sps:$4 sm:$0xff]   ;;  %v2298_v20 = vld [vmem:[%s2826_s12 + $0x34] ss:$12 sps:$4 sm:$0xff]   ;;  %v2303_v23 = vld [vmem:[%s2826_s12 + $0x1b0] ss:$12 sps:$4 sm:$0xff]  }
  0x61   : > { %1408 = vmatprep.subr.bf16.mxu1 %v2282_v9  ;;  %v2300_v21 = vld [vmem:[%s2826_s12 + $0x1b4] ss:$12 sps:$4 sm:$0xff]   ;;  %v2304_v24 = vld [vmem:[%s2826_s12 + $0x1c] ss:$12 sps:$4 sm:$0xff]   ;;  %v2308_v26 = vld [vmem:[%s2826_s12 + $0x18] ss:$12 sps:$4 sm:$0xff]  }
  0x62   : > { %v2306_v25 = vld [vmem:[%s2826_s12 + $0x19c] ss:$12 sps:$4 sm:$0xff]   ;;  %v2309_v27 = vld [vmem:[%s2826_s12 + $0x198] ss:$12 sps:$4 sm:$0xff]   ;;  %v2314_v30 = vld [vmem:[%s2826_s12] ss:$12 sps:$4 sm:$0xff]  }
  0x63   : > { %1366 = vmatpush1.bf16.msra.mxu0 %v2284_v10  ;;  %v2310_v28 = vld [vmem:[%s2826_s12 + $0x4] ss:$12 sps:$4 sm:$0xff]   ;;  %v2315_v31 = vld [vmem:[%s2826_s12 + $0x180] ss:$12 sps:$4 sm:$0xff]   ;;  %v2320_v34 = vld [vmem:[%s2826_s12 + $0x168] ss:$12 sps:$4 sm:$0xff]  }
  0x64   : > { %1409 = vmatpush1.bf16.msra.mxu1 %v2285_v11  ;;  %1367 = vmatprep.subr.bf16.mxu0 %v2286_v12  ;;  %v2312_v29 = vld [vmem:[%s2826_s12 + $0x184] ss:$12 sps:$4 sm:$0xff]   ;;  %v2316_v32 = vld [vmem:[%s2826_s12 + $0x16c] ss:$12 sps:$4 sm:$0xff]   ;;  %v2321_v35 = vld [vmem:[%s2826_s12 + $0x2e8] ss:$12 sps:$4 sm:$0xff]  }
  0x65   : > { %1410 = vmatprep.subr.bf16.mxu1 %v2288_v13  ;;  %v2318_v33 = vld [vmem:[%s2826_s12 + $0x2ec] ss:$12 sps:$4 sm:$0xff]   ;;  %v2322_v36 = vld [vmem:[%s2826_s12 + $0x154] ss:$12 sps:$4 sm:$0xff]   ;;  %v2326_v38 = vld [vmem:[%s2826_s12 + $0x150] ss:$12 sps:$4 sm:$0xff]  }
  0x66   : > { %v2324_v37 = vld [vmem:[%s2826_s12 + $0x2d4] ss:$12 sps:$4 sm:$0xff]   ;;  %v2327_v39 = vld [vmem:[%s2826_s12 + $0x2d0] ss:$12 sps:$4 sm:$0xff]   ;;  %v2332_v42 = vld [vmem:[%s2826_s12 + $0x138] ss:$12 sps:$4 sm:$0xff]  }
  0x67   : > { %1368 = vmatpush1.bf16.msra.mxu0 %v2290_v14  ;;  %v2328_v40 = vld [vmem:[%s2826_s12 + $0x13c] ss:$12 sps:$4 sm:$0xff]   ;;  %v2333_v43 = vld [vmem:[%s2826_s12 + $0x2b8] ss:$12 sps:$4 sm:$0xff]   ;;  %v2338_v46 = vld [vmem:[%s2826_s12 + $0x120] ss:$12 sps:$4 sm:$0xff]  }
  0x68   : > { %1411 = vmatpush1.bf16.msra.mxu1 %v2291_v15  ;;  %1369 = vmatprep.subr.bf16.mxu0 %v2292_v16  ;;  %v2330_v41 = vld [vmem:[%s2826_s12 + $0x2bc] ss:$12 sps:$4 sm:$0xff]   ;;  %v2334_v44 = vld [vmem:[%s2826_s12 + $0x124] ss:$12 sps:$4 sm:$0xff]   ;;  %v2339_v47 = vld [vmem:[%s2826_s12 + $0x2a0] ss:$12 sps:$4 sm:$0xff]  }
  0x69   : > { %1412 = vmatprep.subr.bf16.mxu1 %v2294_v17  ;;  %v2336_v45 = vld [vmem:[%s2826_s12 + $0x2a4] ss:$12 sps:$4 sm:$0xff]   ;;  %v2340_v48 = vld [vmem:[%s2826_s12 + $0x10c] ss:$12 sps:$4 sm:$0xff]   ;;  %v2344_v52 = vld [vmem:[%s2826_s12 + $0x108] ss:$12 sps:$4 sm:$0xff]  }
  0x6a   : > { %v2366_v49 = vld [vmem:[%s3073_s0 + $0x4] ss:$24 sps:$4 sm:$0xff]   ;;  %v2342_v50 = vld [vmem:[%s2826_s12 + $0x28c] ss:$12 sps:$4 sm:$0xff]   ;;  %v2345_v53 = vld [vmem:[%s2826_s12 + $0x288] ss:$12 sps:$4 sm:$0xff]  }
  0x6b   : > { %1370 = vmatpush1.bf16.msra.mxu0 %v2296_v18  ;;  %v2900_v51 = vld [vmem:[%s3073_s0 + $0xc] ss:$24 sps:$4 sm:$0xff]   ;;  %1393 = vmatprep.mubr.bf16.mxu0 %v2366_v49  ;;  %v2346_v54 = vld [vmem:[%s2826_s12 + $0xf4] ss:$12 sps:$4 sm:$0xff]   ;;  %v2350_v56 = vld [vmem:[%s2826_s12 + $0xf0] ss:$12 sps:$4 sm:$0xff]  }
  0x6c   : > { %1413 = vmatpush1.bf16.msra.mxu1 %v2297_v19  ;;  %1371 = vmatprep.subr.bf16.mxu0 %v2298_v20  ;;  %v2348_v55 = vld [vmem:[%s2826_s12 + $0x274] ss:$12 sps:$4 sm:$0xff]   ;;  %v2351_v57 = vld [vmem:[%s2826_s12 + $0x270] ss:$12 sps:$4 sm:$0xff]   ;;  %v2356_v60 = vld [vmem:[%s2826_s12 + $0xd8] ss:$12 sps:$4 sm:$0xff]  }
  0x6d   : > { %1414 = vmatprep.subr.bf16.mxu1 %v2300_v21  ;;  %1436 = vmatprep.mubr.bf16.mxu1 %v2900_v51  ;;  %v2352_v58 = vld [vmem:[%s2826_s12 + $0xdc] ss:$12 sps:$4 sm:$0xff]   ;;  %v2357_v61 = vld [vmem:[%s2826_s12 + $0x258] ss:$12 sps:$4 sm:$0xff]   ;;  %v2362_v0 = vld [vmem:[%s2826_s12 + $0xc0] ss:$12 sps:$4 sm:$0xff]  }
  0x6e   : > { %v2354_v59 = vld [vmem:[%s2826_s12 + $0x25c] ss:$12 sps:$4 sm:$0xff]   ;;  %v2358_v62 = vld [vmem:[%s2826_s12 + $0xc4] ss:$12 sps:$4 sm:$0xff]   ;;  %v2363_v1 = vld [vmem:[%s2826_s12 + $0x240] ss:$12 sps:$4 sm:$0xff]  }
  0x6f   : > { %1372 = vmatpush1.bf16.msra.mxu0 %v2302_v22  ;;  %v2360_v63 = vld [vmem:[%s2826_s12 + $0x244] ss:$12 sps:$4 sm:$0xff]   ;;  %v2372_v2 = vld [vmem:[%s2826_s12 + $0x3ac] ss:$12 sps:$4 sm:$0xff]   ;;  %v2926_v4 = vld [vmem:[%s3073_s0 + $0x8] ss:$24 sps:$4 sm:$0xff]  }
  0x70   : > { %1415 = vmatpush1.bf16.msra.mxu1 %v2303_v23  ;;  %1373 = vmatprep.subr.bf16.mxu0 %v2304_v24  ;;  %v2921_v3 = vld [vmem:[%s3073_s0] ss:$24 sps:$4 sm:$0xff]   ;;  %v2373_v5 = vld [vmem:[%s2826_s12 + $0x170] ss:$12 sps:$4 sm:$0xff]   ;;  %v2370_v6 = vld [vmem:[%s2826_s12 + $0x3a8] ss:$12 sps:$4 sm:$0xff]  }
  0x71   : > { %1416 = vmatprep.subr.bf16.mxu1 %v2306_v25  ;;  %v2374_v7 = vld [vmem:[%s2826_s12 + $0xb0] ss:$12 sps:$4 sm:$0xff]   ;;  %v2377_v8 = vld [vmem:[%s2826_s12 + $0x394] ss:$12 sps:$4 sm:$0xff]   ;;  %v2378_v9 = vld [vmem:[%s2826_s12 + $0x158] ss:$12 sps:$4 sm:$0xff]  }
  0x72   : > { %v2375_v10 = vld [vmem:[%s2826_s12 + $0x390] ss:$12 sps:$4 sm:$0xff]   ;;  %v2379_v11 = vld [vmem:[%s2826_s12 + $0x98] ss:$12 sps:$4 sm:$0xff]   ;;  %v2383_v13 = vld [vmem:[%s2826_s12 + $0x140] ss:$12 sps:$4 sm:$0xff]  }
  0x73   : > { %1374 = vmatpush1.bf16.msra.mxu0 %v2308_v26  ;;  %v2382_v12 = vld [vmem:[%s2826_s12 + $0x37c] ss:$12 sps:$4 sm:$0xff]   ;;  %v2380_v14 = vld [vmem:[%s2826_s12 + $0x378] ss:$12 sps:$4 sm:$0xff]   ;;  %v2384_v15 = vld [vmem:[%s2826_s12 + $0x80] ss:$12 sps:$4 sm:$0xff]  }
  0x74   : > { %1417 = vmatpush1.bf16.msra.mxu1 %v2309_v27  ;;  %1375 = vmatprep.subr.bf16.mxu0 %v2310_v28  ;;  %v2387_v16 = vld [vmem:[%s2826_s12 + $0x364] ss:$12 sps:$4 sm:$0xff]   ;;  %v2388_v17 = vld [vmem:[%s2826_s12 + $0x128] ss:$12 sps:$4 sm:$0xff]   ;;  %v2385_v18 = vld [vmem:[%s2826_s12 + $0x360] ss:$12 sps:$4 sm:$0xff]  }
  0x75   : > { %1418 = vmatprep.subr.bf16.mxu1 %v2312_v29  ;;  %v2389_v19 = vld [vmem:[%s2826_s12 + $0x68] ss:$12 sps:$4 sm:$0xff]   ;;  %v2392_v20 = vld [vmem:[%s2826_s12 + $0x34c] ss:$12 sps:$4 sm:$0xff]   ;;  %v2393_v21 = vld [vmem:[%s2826_s12 + $0x110] ss:$12 sps:$4 sm:$0xff]  }
  0x76   : > { %v2390_v22 = vld [vmem:[%s2826_s12 + $0x348] ss:$12 sps:$4 sm:$0xff]   ;;  %v2394_v23 = vld [vmem:[%s2826_s12 + $0x50] ss:$12 sps:$4 sm:$0xff]   ;;  %v2398_v25 = vld [vmem:[%s2826_s12 + $0xf8] ss:$12 sps:$4 sm:$0xff]  }
  0x77   : > { %1376 = vmatpush1.bf16.msra.mxu0 %v2314_v30  ;;  %v2397_v24 = vld [vmem:[%s2826_s12 + $0x334] ss:$12 sps:$4 sm:$0xff]   ;;  %v2395_v26 = vld [vmem:[%s2826_s12 + $0x330] ss:$12 sps:$4 sm:$0xff]   ;;  %v2399_v27 = vld [vmem:[%s2826_s12 + $0x38] ss:$12 sps:$4 sm:$0xff]  }
  0x78   : > { %1419 = vmatpush1.bf16.msra.mxu1 %v2315_v31  ;;  %1377 = vmatprep.subr.bf16.mxu0 %v2316_v32  ;;  %v2402_v28 = vld [vmem:[%s2826_s12 + $0x31c] ss:$12 sps:$4 sm:$0xff]   ;;  %v2403_v29 = vld [vmem:[%s2826_s12 + $0xe0] ss:$12 sps:$4 sm:$0xff]   ;;  %v2400_v30 = vld [vmem:[%s2826_s12 + $0x318] ss:$12 sps:$4 sm:$0xff]  }
  0x79   : > { %1420 = vmatprep.subr.bf16.mxu1 %v2318_v33  ;;  %v2404_v31 = vld [vmem:[%s2826_s12 + $0x20] ss:$12 sps:$4 sm:$0xff]   ;;  %v2407_v32 = vld [vmem:[%s2826_s12 + $0x304] ss:$12 sps:$4 sm:$0xff]   ;;  %v2408_v33 = vld [vmem:[%s2826_s12 + $0xc8] ss:$12 sps:$4 sm:$0xff]  }
  0x7a   : > { %vm1623_vm0 = vcmask 130048   ;;  %vm2661_vm1 = vmmov 0   ;;  %s2182_s30 = smul.u32 24, %s2822_s1  ;;  %s3104_s6 = sld [smem:[#allocation20_spill]] }
  0x7b   : > { %1378 = vmatpush2.bf16.msra.mxu0 %v2320_v34  ;;  %v2405_v34 = vld [vmem:[%s2826_s12 + $0x300] ss:$12 sps:$4 sm:$0xff]   ;;  %s2101_s11 = smul.u32 384, %s2643_s21  ;;  %s1793_s24 = scalar_lea.sflag [#allocation4], %s2822_s1 }
  0x7c   : > { %1421 = vmatpush2.bf16.msra.mxu1 %v2321_v35  ;;  %1379 = vmatprep.subr.bf16.mxu0 %v2322_v36  ;;  %v2409_v35 = vld [vmem:[%s2826_s12 + $0x8] ss:$12 sps:$4 sm:$0xff]   ;;  %v2412_v36 = vld [vmem:[%s2826_s12 + $0x46c] ss:$12 sps:$4 sm:$0xff]   ;;  %s329_s18 = scalar_lea.vmem [#allocation8], %s2182_s30  ;;  %p3105_p13 = scmp.ne.s32.totalorder %s3093_s29, 0 }
  0x7d   : > { %1422 = vmatprep.subr.bf16.mxu1 %v2324_v37  ;;  %v2413_v37 = vld [vmem:[%s2826_s12 + $0x2f0] ss:$12 sps:$4 sm:$0xff]   ;;  %s2662_s10 = smov [#allocation8]  }
  0x7e   : > { %s2567_s14 = sshll.u32 %s2662_s10, 4  ;;  %s2568_s14 = int_to_ptr.vmem [resolvable:$false] %s2567_s14 }
  0x7f   : > { %1380 = vmatpush2.bf16.msra.mxu0 %v2326_v38  ;;  %v2410_v38 = vld [vmem:[%s2826_s12 + $0x468] ss:$12 sps:$4 sm:$0xff]   ;;  %s2569_s21 = scalar_lea.vmem %s2568_s14, 768 }
  0x80   : > { %1423 = vmatpush2.bf16.msra.mxu1 %v2327_v39  ;;  %1381 = vmatprep.subr.bf16.mxu0 %v2328_v40  ;;  %v2414_v39 = vld [vmem:[%s2826_s12 + $0x230] ss:$12 sps:$4 sm:$0xff]   ;;  %v2417_v40 = vld [vmem:[%s2826_s12 + $0x454] ss:$12 sps:$4 sm:$0xff]  }
  0x81   : > { %1424 = vmatprep.subr.bf16.mxu1 %v2330_v41  ;;  %v2418_v41 = vld [vmem:[%s2826_s12 + $0x2d8] ss:$12 sps:$4 sm:$0xff]  }
  0x83   : > { %1382 = vmatpush2.bf16.msra.mxu0 %v2332_v42  ;;  %v2415_v42 = vld [vmem:[%s2826_s12 + $0x450] ss:$12 sps:$4 sm:$0xff]  }
  0x84   : > { %1425 = vmatpush2.bf16.msra.mxu1 %v2333_v43  ;;  %1383 = vmatprep.subr.bf16.mxu0 %v2334_v44  ;;  %v2419_v43 = vld [vmem:[%s2826_s12 + $0x218] ss:$12 sps:$4 sm:$0xff]   ;;  %v2973_v44 = vld [vmem:[%s3073_s0 + $0x14] ss:$24 sps:$4 sm:$0xff]  }
  0x85   : > { %1426 = vmatprep.subr.bf16.mxu1 %v2336_v45  ;;  %v2422_v45 = vld [vmem:[%s2826_s12 + $0x43c] ss:$12 sps:$4 sm:$0xff]  }
  0x87   : > { %1384 = vmatpush2.bf16.msra.mxu0 %v2338_v46  ;;  %v2423_v46 = vld [vmem:[%s2826_s12 + $0x2c0] ss:$12 sps:$4 sm:$0xff]  }
  0x88   : > { %1427 = vmatpush2.bf16.msra.mxu1 %v2339_v47  ;;  %1385 = vmatprep.subr.bf16.mxu0 %v2340_v48  ;;  %v2420_v47 = vld [vmem:[%s2826_s12 + $0x438] ss:$12 sps:$4 sm:$0xff]   ;;  %v2424_v48 = vld [vmem:[%s2826_s12 + $0x200] ss:$12 sps:$4 sm:$0xff]  }
  0x89   : > { %1428 = vmatprep.subr.bf16.mxu1 %v2342_v50  ;;  %v2428_v50 = vld [vmem:[%s2826_s12 + $0x2a8] ss:$12 sps:$4 sm:$0xff]  }
  0x8b   : > { %1386 = vmatpush2.bf16.msra.mxu0 %v2344_v52  ;;  %v2425_v52 = vld [vmem:[%s2826_s12 + $0x420] ss:$12 sps:$4 sm:$0xff]  }
  0x8c   : > { %1429 = vmatpush2.bf16.msra.mxu1 %v2345_v53  ;;  %1387 = vmatprep.subr.bf16.mxu0 %v2346_v54  ;;  %v2429_v53 = vld [vmem:[%s2826_s12 + $0x1e8] ss:$12 sps:$4 sm:$0xff]   ;;  %v2432_v54 = vld [vmem:[%s2826_s12 + $0x40c] ss:$12 sps:$4 sm:$0xff]  }
  0x8d   : > { %1430 = vmatprep.subr.bf16.mxu1 %v2348_v55  ;;  %v2430_v55 = vld [vmem:[%s2826_s12 + $0x408] ss:$12 sps:$4 sm:$0xff]  }
  0x8f   : > { %1388 = vmatpush2.bf16.msra.mxu0 %v2350_v56  ;;  %v2434_v56 = vld [vmem:[%s2826_s12 + $0x1d0] ss:$12 sps:$4 sm:$0xff]  }
  0x90   : > { %1431 = vmatpush2.bf16.msra.mxu1 %v2351_v57  ;;  %1389 = vmatprep.subr.bf16.mxu0 %v2352_v58  ;;  %v2437_v57 = vld [vmem:[%s2826_s12 + $0x3f4] ss:$12 sps:$4 sm:$0xff]   ;;  %v2438_v58 = vld [vmem:[%s2826_s12 + $0x278] ss:$12 sps:$4 sm:$0xff]  }
  0x91   : > { %1432 = vmatprep.subr.bf16.mxu1 %v2354_v59  ;;  %v2435_v59 = vld [vmem:[%s2826_s12 + $0x3f0] ss:$12 sps:$4 sm:$0xff]  }
  0x93   : > { %1390 = vmatpush2.bf16.msra.mxu0 %v2356_v60  ;;  %v2439_v60 = vld [vmem:[%s2826_s12 + $0x1b8] ss:$12 sps:$4 sm:$0xff]  }
  0x94   : > { %1433 = vmatpush2.bf16.msra.mxu1 %v2357_v61  ;;  %1391 = vmatprep.subr.bf16.mxu0 %v2358_v62  ;;  %v2442_v61 = vld [vmem:[%s2826_s12 + $0x3dc] ss:$12 sps:$4 sm:$0xff]   ;;  %v2443_v62 = vld [vmem:[%s2826_s12 + $0x260] ss:$12 sps:$4 sm:$0xff]  }
  0x95   : > { %1434 = vmatprep.subr.bf16.mxu1 %v2360_v63  ;;  %v2440_v63 = vld [vmem:[%s2826_s12 + $0x3d8] ss:$12 sps:$4 sm:$0xff]  }
  0x97   : > { %1392 = vmatpush2.bf16.msra.mxu0 %v2362_v0  ;;  %v2444_v0 = vld [vmem:[%s2826_s12 + $0x1a0] ss:$12 sps:$4 sm:$0xff]  }
  0x98   : > { %1435 = vmatpush2.bf16.msra.mxu1 %v2363_v1  ;;  %1447 = vmatprep.subr.bf16.mxu0 %v2372_v2  ;;  %v2447_v1 = vld [vmem:[%s2826_s12 + $0x3c4] ss:$12 sps:$4 sm:$0xff]   ;;  %v2448_v2 = vld [vmem:[%s2826_s12 + $0x248] ss:$12 sps:$4 sm:$0xff]  }
  0x99   : > { %2102 = vmatprep.subr.bf16.mxu1 %v2373_v5  ;;  %v2449_v5 = vld [vmem:[%s2826_s12 + $0x188] ss:$12 sps:$4 sm:$0xff]  }
  0x9a   : > { %1394 = vmatmul.mubr.bf16.vlgmr.msra.gmra.mxu0 %v2921_v3 }
  0x9b   : > { %1437 = vmatmul.mubr.bf16.vlgmr.msra.gmra.mxu1 %v2926_v4  ;;  %1448 = vmatpush1.bf16.msra.mxu0 %v2370_v6  ;;  %v2453_v6 = vld [vmem:[%s2826_s12 + $0x470] ss:$12 sps:$4 sm:$0xff]  }
  0x9c   : > { %2103 = vmatpush3.bf16.msra.mxu1 %v2374_v7  ;;  %1449 = vmatprep.subr.bf16.mxu0 %v2377_v8  ;;  %v2450_v7 = vld [vmem:[%s3073_s0 + $0x10] ss:$24 sps:$4 sm:$0xff]  }
  0x9d   : > { %2104 = vmatprep.subr.bf16.mxu1 %v2378_v9  ;;  %1522 = vmatprep.mubr.bf16.mxu1 %v2366_v49  ;;  %v2427_v49 = vld [vmem:[%s2826_s12 + $0x424] ss:$12 sps:$4 sm:$0xff]  }
  0x9e   : > { %1479 = vmatprep.mubr.bf16.mxu0 %v2973_v44  ;;  %v2454_v8 = vld [vmem:[%s2826_s12 + $0x3b0] ss:$12 sps:$4 sm:$0xff]   ;;  %v2455_v9 = vld [vmem:[%s2826_s12 + $0x458] ss:$12 sps:$4 sm:$0xff]  }
  0x9f   : > { %1450 = vmatpush1.bf16.msra.mxu0 %v2375_v10  ;;  %v2456_v10 = vld [vmem:[%s2826_s12 + $0x398] ss:$12 sps:$4 sm:$0xff]  }
  0xa0   : > { %2105 = vmatpush3.bf16.msra.mxu1 %v2379_v11  ;;  %1451 = vmatprep.subr.bf16.mxu0 %v2382_v12  ;;  %v2457_v11 = vld [vmem:[%s2826_s12 + $0x440] ss:$12 sps:$4 sm:$0xff]  }
  0xa1   : > { %2106 = vmatprep.subr.bf16.mxu1 %v2383_v13  ;;  %v2458_v12 = vld [vmem:[%s2826_s12 + $0x380] ss:$12 sps:$4 sm:$0xff]   ;;  %v2459_v13 = vld [vmem:[%s2826_s12 + $0x428] ss:$12 sps:$4 sm:$0xff]  }
  0xa3   : > { %1452 = vmatpush1.bf16.msra.mxu0 %v2380_v14  ;;  %v2460_v14 = vld [vmem:[%s2826_s12 + $0x368] ss:$12 sps:$4 sm:$0xff]  }
  0xa4   : > { %2107 = vmatpush3.bf16.msra.mxu1 %v2384_v15  ;;  %1453 = vmatprep.subr.bf16.mxu0 %v2387_v16  ;;  %v2462_v15 = vld [vmem:[%s2826_s12 + $0x350] ss:$12 sps:$4 sm:$0xff]   ;;  %v2463_v16 = vld [vmem:[%s2826_s12 + $0x3f8] ss:$12 sps:$4 sm:$0xff]  }
  0xa5   : > { %2108 = vmatprep.subr.bf16.mxu1 %v2388_v17  ;;  %v2464_v17 = vld [vmem:[%s2826_s12 + $0x338] ss:$12 sps:$4 sm:$0xff]  }
  0xa7   : > { %1454 = vmatpush1.bf16.msra.mxu0 %v2385_v18  ;;  %v2465_v18 = vld [vmem:[%s2826_s12 + $0x3e0] ss:$12 sps:$4 sm:$0xff]  }
  0xa8   : > { %2109 = vmatpush3.bf16.msra.mxu1 %v2389_v19  ;;  %1455 = vmatprep.subr.bf16.mxu0 %v2392_v20  ;;  %v2466_v19 = vld [vmem:[%s2826_s12 + $0x320] ss:$12 sps:$4 sm:$0xff]   ;;  %v2467_v20 = vld [vmem:[%s2826_s12 + $0x3c8] ss:$12 sps:$4 sm:$0xff]  }
  0xa9   : > { %2110 = vmatprep.subr.bf16.mxu1 %v2393_v21  ;;  %v2468_v21 = vld [vmem:[%s2826_s12 + $0x308] ss:$12 sps:$4 sm:$0xff]  }
  0xab   : > { %1456 = vmatpush1.bf16.msra.mxu0 %v2390_v22  ;;  %v2659_v22 = vmov 0.0  }
  0xac   : > { %2111 = vmatpush3.bf16.msra.mxu1 %v2394_v23  ;;  %1457 = vmatprep.subr.bf16.mxu0 %v2397_v24  ;;  %v1780_v23 = vld [vmem:[%s3077_s4] sm:$0xff]  ;;  %v2660_v24 = vmov 0  }
  0xad   : > { %2112 = vmatprep.subr.bf16.mxu1 %v2398_v25  ;;  %2267 = vset.pattern.permute.xlu0 %v2660_v24  ;;  %v548_v25 = vlaneseq }
  0xae   : > { %1783 = vperm.xlu0 %2267, %v1780_v23  }
  0xaf   : > { %1458 = vmatpush1.bf16.msra.mxu0 %v2395_v26 }
  0xb0   : > { %2113 = vmatpush3.bf16.msra.mxu1 %v2399_v27  ;;  %1459 = vmatprep.subr.bf16.mxu0 %v2402_v28  ;;  %v549_v27 = vshrl.u32 %v548_v25, 7 }
  0xb1   : > { %2114 = vmatprep.subr.bf16.mxu1 %v2403_v29 }
  0xb3   : > { %1460 = vmatpush1.bf16.msra.mxu0 %v2400_v30  ;;  %v554_v30 = vsub.s32 1, %v549_v27 }
  0xb4   : > { %2115 = vmatpush3.bf16.msra.mxu1 %v2404_v31  ;;  %1461 = vmatprep.subr.bf16.mxu0 %v2407_v32  ;;  %v546_v31 = vld [vmem:[%s2834_s9] sm:$0x7]  ;;  %v550_v32 = vsub.s32 0, %v549_v27  ;;  %s1805_s9 = scalar_lea.hbm %s3104_s6, %s2101_s11 }
  0xb5   : > { %2116 = vmatprep.subr.bf16.mxu1 %v2408_v33 }
  0xb7   : > { %1462 = vmatpush1.bf16.msra.mxu0 %v2405_v34 }
  0xb8   : > { %2117 = vmatpush3.bf16.msra.mxu1 %v2409_v35  ;;  %1463 = vmatprep.subr.bf16.mxu0 %v2412_v36  ;;  %v555_v35 = vrot.slane %v546_v31, %v554_v30  ;;  %v551_v36 = vrot.slane %v546_v31, %v550_v32 }
  0xb9   : > { %2124 = vmatprep.subr.bf16.mxu1 %v2413_v37 }
  0xbb   : > { %1523 = vmatmul.mubr.bf16.vlgmr.msra.gmra.mxu1 %v2921_v3  ;;  %1464 = vmatpush2.bf16.msra.mxu0 %v2410_v38  ;;  %v2445_v3 = vld [vmem:[%s2826_s12 + $0x3c0] ss:$12 sps:$4 sm:$0xff]  }
  0xbc   : > { %2125 = vmatpush3.bf16.msra.mxu1 %v2414_v39  ;;  %1465 = vmatprep.subr.bf16.mxu0 %v2417_v40 }
  0xbd   : > { %2126 = vmatprep.subr.bf16.mxu1 %v2418_v41  ;;  %1563 = vmatprep.mubr.bf16.mxu1 %v2900_v51  ;;  %v2433_v51 = vld [vmem:[%s2826_s12 + $0x290] ss:$12 sps:$4 sm:$0xff]  }
  0xbf   : > { %1466 = vmatpush2.bf16.msra.mxu0 %v2415_v42 }
  0xc0   : > { %2127 = vmatpush3.bf16.msra.mxu1 %v2419_v43  ;;  %1467 = vmatprep.subr.bf16.mxu0 %v2422_v45 }
  0xc1   : > { %2128 = vmatprep.subr.bf16.mxu1 %v2423_v46 }
  0xc3   : > { %1468 = vmatpush2.bf16.msra.mxu0 %v2420_v47 }
  0xc4   : > { %2129 = vmatpush3.bf16.msra.mxu1 %v2424_v48  ;;  %1469 = vmatprep.subr.bf16.mxu0 %v2427_v49 }
  0xc5   : > { %2130 = vmatprep.subr.bf16.mxu1 %v2428_v50 }
  0xc7   : > { %1470 = vmatpush2.bf16.msra.mxu0 %v2425_v52 }
  0xc8   : > { %2131 = vmatpush3.bf16.msra.mxu1 %v2429_v53  ;;  %1471 = vmatprep.subr.bf16.mxu0 %v2432_v54 }
  0xc9   : > { %2132 = vmatprep.subr.bf16.mxu1 %v2433_v51 }
  0xcb   : > { %1472 = vmatpush2.bf16.msra.mxu0 %v2430_v55 }
  0xcc   : > { %2133 = vmatpush3.bf16.msra.mxu1 %v2434_v56  ;;  %1473 = vmatprep.subr.bf16.mxu0 %v2437_v57 }
  0xcd   : > { %2134 = vmatprep.subr.bf16.mxu1 %v2438_v58 }
  0xcf   : > { %1474 = vmatpush2.bf16.msra.mxu0 %v2435_v59 }
  0xd0   : > { %2135 = vmatpush3.bf16.msra.mxu1 %v2439_v60  ;;  %1475 = vmatprep.subr.bf16.mxu0 %v2442_v61 }
  0xd1   : > { %2136 = vmatprep.subr.bf16.mxu1 %v2443_v62 }
  0xd3   : > { %1476 = vmatpush2.bf16.msra.mxu0 %v2440_v63 }
  0xd4   : > { %2137 = vmatpush3.bf16.msra.mxu1 %v2444_v0  ;;  %1477 = vmatprep.subr.bf16.mxu0 %v2447_v1  ;;  %v1622_v1 = vld [vmem:[#allocation7] sm:$0xff] }
  0xd5   : > { %2138 = vmatprep.subr.bf16.mxu1 %v2448_v2 }
  0xd7   : > { %1478 = vmatpush2.bf16.msra.mxu0 %v2445_v3  ;;  %v558_v3 = vsub.s32 2, %v549_v27 }
  0xd8   : > { %2139 = vmatpush3.bf16.msra.mxu1 %v2449_v5  ;;  %2146 = vmatprep.subr.bf16.mxu0 %v2453_v6 }
  0xd9   : > { %v559_v6 = vrot.slane %v546_v31, %v558_v3 }
  0xda   : > { %1480 = vmatmul.mubr.bf16.vlgmr.msra.gmra.mxu0 %v2450_v7 }
  0xdb   : > { %1564 = vmatmul.mubr.bf16.vlgmr.msra.gmra.mxu1 %v2926_v4  ;;  %2147 = vmatpush3.bf16.msra.mxu0 %v2454_v8  ;;  %v2461_v4 = vld [vmem:[%s2826_s12 + $0x410] ss:$12 sps:$4 sm:$0xff]   ;;  %s1807_s12 = sshll.u32 %s329_s18, 4  ;;  %s1808_s12 = int_to_ptr.vmem [resolvable:$true] %s1807_s12 }
  0xdc   : > { %1604 = vmatprep.mubr.bf16.mxu0 %v2973_v44  ;;  %2148 = vmatprep.subr.bf16.mxu0 %v2455_v9  ;;  %s2563_s28 = scalar_lea.vmem %s1808_s12, 384  ;;  %p2570_p10 = scmp.lt.s32.totalorder %s1808_s12, %s2568_s14 }
  0xdd   : > { %1691 = vmatprep.mubr.f32.mxu1 %v2659_v22  ;;  %p2564_p3 = scmp.ne.s32.totalorder %s1808_s12, %s2563_s28  ;;  %p2571_p11 = scmp.lt.s32.totalorder %s2569_s21, %s2563_s28 }
  0xdf   : > { %2149 = vmatpush3.bf16.msra.mxu0 %v2456_v10  ;;  %p2565_p4 = pnand %p2564_p3, %p3105_p13  ;;  %p2572_p5 = por %p2571_p11, %p2570_p10 }
  0xe0   : > { %2150 = vmatprep.subr.bf16.mxu0 %v2457_v11 }
  0xe1   : > { %p2566_p6 = pneg %p2565_p4 }
  0xe3   : > { %2151 = vmatpush3.bf16.msra.mxu0 %v2458_v12  ;;  %p2573_p1 = pnand %p2572_p5, %p2566_p6 }
  0xe4   : > { %2152 = vmatprep.subr.bf16.mxu0 %v2459_v13 }
  0xe7   : > { %2153 = vmatpush3.bf16.msra.mxu0 %v2460_v14 }
  0xe8   : > { %2154 = vmatprep.subr.bf16.mxu0 %v2461_v4 }
  0xeb   : > { %2155 = vmatpush3.bf16.msra.mxu0 %v2462_v15 }
  0xec   : > { %2156 = vmatprep.subr.bf16.mxu0 %v2463_v16 }
  0xef   : > { %2157 = vmatpush3.bf16.msra.mxu0 %v2464_v17 }
  0xf0   : > { %2158 = vmatprep.subr.bf16.mxu0 %v2465_v18 }
  0xf3   : > { %2159 = vmatpush3.bf16.msra.mxu0 %v2466_v19 }
  0xf4   : > { %2160 = vmatprep.subr.bf16.mxu0 %v2467_v20 }
  0xf7   : > { %2161 = vmatpush3.bf16.msra.mxu0 %v2468_v21 }
  0xfa   : > { %1605 = vmatmul.mubr.bf16.vlgmr.msra.gmra.mxu0 %v2450_v7 }
 0x129   : > { %v1784_v27 = vpop.permute.xlu0 %1783 }
 0x15a   : > { %v1395_v26 = vpop.f32.mrf.mxu0 }
 0x15b   : > { %v1438_v29 = vpop.f32.mrf.mxu1  ;;  %v1396_v43 = vadd.f32 %v1395_v26, %v551_v36 }
 0x15c   : > { %v1397_v28 = vpop.f32.mrf.mxu0 }
 0x15d   : > { %v1440_v34 = vpop.f32.mrf.mxu1  ;;  %v1398_v41 = vadd.f32 %v1397_v28, %v555_v35  ;;  %v1439_v52 = vadd.f32 %v1438_v29, %v1396_v43 }
 0x15e   : > { %v1399_v33 = vpop.f32.mrf.mxu0 }
 0x15f   : > { %v1442_v38 = vpop.f32.mrf.mxu1  ;;  %v1400_v39 = vadd.f32 %v1399_v33, %v551_v36  ;;  %v1441_v49 = vadd.f32 %v1440_v34, %v1398_v41 }
 0x160   : > { %v1401_v37 = vpop.f32.mrf.mxu0 }
 0x161   : > { %v1402_v42 = vadd.f32 %v1401_v37, %v555_v35  ;;  %v1444_v44 = vpop.f32.mrf.mxu1  ;;  %v1443_v46 = vadd.f32 %v1442_v38, %v1400_v39 }
 0x163   : > { %v1445_v50 = vadd.f32 %v1444_v44, %v1402_v42 }
 0x17b   : > { %v2118_v47 = vpop.f32.mrf.mxu1 }
 0x17d   : > { %v2119_v56 = vpop.f32.mrf.mxu1 }
 0x17e   : > { %v2120_v7 = vadd.f32 %v2119_v56, %v2118_v47 }
 0x17f   : > { %v2121_v58 = vpop.f32.mrf.mxu1 }
 0x180   : > { %v1525_v12 = vadd.f32 %v2120_v7, %v559_v6 }
 0x181   : > { %v2122_v59 = vpop.f32.mrf.mxu1 }
 0x182   : > { %v2123_v10 = vadd.f32 %v2122_v59, %v2121_v58 }
 0x184   : > { %v1528_v15 = vadd.f32 %v2123_v10, %v559_v6 }
 0x19a   : > { %v1481_v40 = vpop.f32.mrf.mxu0 }
 0x19b   : > { %v1482_v57 = vadd.f32 %v1481_v40, %v1439_v52  ;;  %v2140_v60 = vpop.f32.mrf.mxu1 }
 0x19c   : > { %v1483_v45 = vpop.f32.mrf.mxu0 }
 0x19d   : > { %v1484_v51 = vadd.f32 %v1483_v45, %v1441_v49  ;;  %v2141_v0 = vpop.f32.mrf.mxu1 }
 0x19e   : > { %v1485_v48 = vpop.f32.mrf.mxu0  ;;  %v2142_v13 = vadd.f32 %v2141_v0, %v2140_v60 }
 0x19f   : > { %v1486_v53 = vadd.f32 %v1485_v48, %v1443_v46  ;;  %v2143_v5 = vpop.f32.mrf.mxu1 }
 0x1a0   : > { %v1487_v54 = vpop.f32.mrf.mxu0  ;;  %v1566_v18 = vadd.f32 %v2142_v13, %v1525_v12 }
 0x1a1   : > { %v1488_v55 = vadd.f32 %v1487_v54, %v1445_v50  ;;  %v2144_v8 = vpop.f32.mrf.mxu1 }
 0x1a2   : > { %v2145_v14 = vadd.f32 %v2144_v8, %v2143_v5 }
 0x1a3   : > { %2469 = vtanh.f32 %v1488_v55 }
 0x1a4   : > { %2471 = vtanh.f32 %v1486_v53  ;;  %v1569_v19 = vadd.f32 %v2145_v14, %v1528_v15 }
 0x1a5   : > { %2473 = vtanh.f32 %v1484_v51 }
 0x1a6   : > { %2475 = vtanh.f32 %v1482_v57 }
 0x1b0   : > { %v2470_v61 = vpop.eup %2469 }
 0x1b1   : > { %v2472_v62 = vpop.eup %2471  ;;  %1655 = vmatprep.subr.mxu1 %v2470_v61 }
 0x1b2   : > { %v2474_v63 = vpop.eup %2473  ;;  %1656 = vmatpush1.msra.mxu1 %v2472_v62 }
 0x1b3   : > { %v2476_v2 = vpop.eup %2475  ;;  %1657 = vmatprep.subr.mxu1 %v2474_v63 }
 0x1b4   : > { %1658 = vmatpush1.msra.mxu1 %v2476_v2 }
 0x1b5   : > { %2094 = vmatmul.mubr.msk.f32.vlgmr.msra.gmra.mxu1 %vm1623_vm0, %v1622_v1  ;;  %2171 = vmatprep.subr.mxu1 %v2659_v22 }
 0x1b6   : > { %2175 = vmatprep.mubr.msk.f32.mxu1 %vm2661_vm1, %v2659_v22 }
 0x1ba   : > { %v2162_v9 = vpop.f32.mrf.mxu0 }
 0x1bc   : > { %v2163_v11 = vpop.f32.mrf.mxu0 }
 0x1bd   : > { %v2164_v16 = vadd.f32 %v2163_v11, %v2162_v9 }
 0x1be   : > { %v2165_v4 = vpop.f32.mrf.mxu0 }
 0x1bf   : > { %v1607_v21 = vadd.f32 %v2164_v16, %v1566_v18 }
 0x1c0   : > { %v2166_v17 = vpop.f32.mrf.mxu0 }
 0x1c1   : > { %v2167_v20 = vadd.f32 %v2166_v17, %v2165_v4 }
 0x1c3   : > { %v1610_v23 = vadd.f32 %v2167_v20, %v1569_v19 }
 0x1c5   : > { %2477 = vtanh.f32 %v1610_v23 }
 0x1c6   : > { %2479 = vtanh.f32 %v1607_v21 }
 0x1d2   : > { %v2478_v24 = vpop.eup %2477 }
 0x1d3   : > { %2172 = vmatpush3.msra.mxu1 %v2478_v24  ;;  %v2480_v25 = vpop.eup %2479 }
 0x1d4   : > { %2173 = vmatprep.subr.mxu1 %v2659_v22 }
 0x1d5   : > { %2174 = vmatpush3.msra.mxu1 %v2480_v25 }
 0x1d6   : > { %2176 = vmatmul.mubr.msk.f32.vlgmr.msra.gmra.mxu1 %vm1623_vm0, %v1622_v1 }
 0x275   : > { %v1693_v26 = vpop.f32.mrf.mxu1 }
 0x276   : > { %v1786_v29 = vmul.f32 %v1784_v27, %v1693_v26 }
 0x277   : > { %v1695_v28 = vpop.f32.mrf.mxu1 }
 0x278   : > { %v1787_v30 = vmul.f32 %v1784_v27, %v1695_v28  ;;  %1789 = vst [vmem:[%s329_s18] sm:$0xff] %v1786_v29 }
 0x27a   : > { %1790 = vst [vmem:[%s329_s18 + $0x8] sm:$0xff] %v1787_v30 }
 0x296   : > { %v1764_v31 = vpop.f32.mrf.mxu1 }
 0x297   : > { %v1788_v33 = vmul.f32 %v1784_v27, %v1764_v31 }
 0x298   : > { %v2177_v32 = vpop.f32.mrf.mxu1 }
 0x299   : > { %1791 = vst [vmem:[%s329_s18 + $0x10] sm:$0xff] %v1788_v33 }
 0x29a   : > { %2576 = shalt.err (!%p2573_p1)
}
 0x29b   : > { %s2577_s15 = scalar_lea.hbm %s1805_s9, 384  ;;  %s2581_s16 = scalar_lea.hbm %s3104_s6, 768 }
 0x29c   : > { %p2578_p7 = scmp.ne.s32.totalorder %s1805_s9, %s2577_s15  ;;  %p2582_p0 = scmp.lt.s32.totalorder %s1805_s9, %s3104_s6 }
 0x29d   : > { %p2583_p2 = scmp.lt.s32.totalorder %s2581_s16, %s2577_s15 }
 0x29e   : > { %p2579_p9 = pnand %p2578_p7, %p3105_p13 }
 0x29f   : > { %p2584_p8 = por %p2583_p2, %p2582_p0 }
 0x2a0   : > { %p2580_p12 = pneg %p2579_p9 }
 0x2a2   : > { %p2585_p3 = pnand %p2584_p8, %p2580_p12 }
 0x2a4   : > { %2588 = shalt.err (!%p2585_p3)
}
 0x2a5   : > { %2191 = dma.vmem_to_hbm [thread:$0]  (%p3105_p13), %s1808_s12, 384, %s1805_s9, %s1793_s24  }
 0x2a6 PF: > { %s3106_s13 = sld [smem:[#allocation13_spill]]  ;;  %p3109_p6 = scmp.ge.s32.totalorder %s2651_s23, 2 }
 0x2a7   : > { %s3107_s17 = sld [smem:[#allocation15_spill]] }
 0x2ac   : > { %s1819_s3 = sand.u32 1, %s3106_s13  }
 0x2ad   : > { %p3108_p4 = scmp.ne.s32.totalorder %s3107_s17, 0  ;;  %s1820_s8 = scalar_lea.sflag [#allocation4], %s1819_s3 }
 0x2af   : > { %p2205_p10 = pnand %p3109_p6, %p3108_p4 }
 0x2b1   : > { %p2206_p11 = pneg %p2205_p10 }
 0x2b3   : > { %2626 = dma.done.wait (%p2206_p11), %s1820_s8, 384  }
 0x2b4   : > { %2628 = vsyncadd (%p2206_p11), %s1820_s8, 4294966912  ;;  %s24_s23 = sadd.s32 1, %s2651_s23   ;;  %s3110_s27 = sld [smem:[#allocation14_spill]] }
 0x2b5   : > { %p21_p5 = scmp.ge.s32.totalorder %s24_s23, 4   ;;  %s3111_s20 = sld [smem:[#allocation17_spill]] }
 0x2b6   : > { %s3112_s29 = sld [smem:[#allocation16_spill]]  ;;  %s3113_s18 = smov %s2635_s19 }
 0x2b7   : > { %s3115_s21 = smov %s2647_s22 }
 0x2b8   :  { %23 = sbr.rel (!%p21_p5) target bundleno = 12 (0xc), region = 114 }
 0x2ba   : > { %s3114_s19 = smov %s3110_s27 }
 0x2bc   : > { %s3116_s22 = smov %s3112_s29 }
 0x2bd   :  { %1825 = vsyncpa [#allocation3], 1 }
 0x2be   :  { %1827 = vsyncpa [#allocation3 + $0x1], 1 }
 0x2bf   :  { %1828 = vsyncpa [#allocation6], 1 }
 0x2c0   :  { %1830 = vsyncpa [#allocation6 + $0x1], 1 }
 0x2c1   :  { %1831 = vsyncpa [#allocation4], 1 }
 0x2c2   :  { %1833 = vsyncpa [#allocation4 + $0x1], 1 }

</bundles_post_ra>
